<compile_context>
chip_gen: v7x
topology: tpu7x:2x2x1
jax: 0.10.0
libtpu: 0.0.40
codegen_flags: <defaults>
</compile_context>

<pallas_src>
import functools

import jax
import jax.numpy as jnp
import numpy as np
from jax import lax
from jax.experimental import pallas as pl
from jax.experimental.pallas import tpu as pltpu

_MIB = 1024 * 1024


def _make_gp_kernel(has_var):
    """grid = (B, Npad // tk); N is the reduction axis (last, 'arbitrary')."""

    def kernel(*refs):
        if has_var:
            (kt_ref, yt_ref, alpha_ref, mean_ref, ktest_ref, var_ref,
             mean_out_ref, cov_out_ref, mean_acc_ref) = refs
        else:
            (kt_ref, yt_ref, alpha_ref, mean_ref, ktest_ref,
             mean_out_ref, cov_out_ref, mean_acc_ref) = refs
            var_ref = None

        k = pl.program_id(1)

        @pl.when(k == 0)
        def _():
            mean_acc_ref[...] = jnp.zeros_like(mean_acc_ref)
            base = ktest_ref[0].astype(jnp.float32)          # (M, M)
            if has_var:
                m = base.shape[0]
                row = lax.broadcasted_iota(jnp.int32, (m, m), 0)
                col = lax.broadcasted_iota(jnp.int32, (m, m), 1)
                base = base + jnp.where(row == col,
                                        var_ref[...].astype(jnp.float32), 0.0)
            cov_out_ref[0] = base.astype(cov_out_ref.dtype)

        kt = kt_ref[0]      # (M, tk)   bf16/f32
        yt = yt_ref[0]      # (M, tk)   bf16/f32
        a = alpha_ref[0]    # (tk, D)   bf16/f32

        # Partial K^T @ alpha (transpose-free; f32 accumulation).
        # TODO(synk): with D << 128 this matmul under-uses MXU lanes and the (M,D)
        # store is masked; could be offloaded to XLA or packed lane-dense.
        mean_acc_ref[...] += lax.dot_general(
            kt, a, (((1,), (0,)), ((), ())), preferred_element_type=jnp.float32)

        # Partial Yt @ Yt^T, subtracted directly from the resident output block.
        yty = lax.dot_general(
            yt, yt, (((1,), (1,)), ((), ())), preferred_element_type=jnp.float32)
        cov_out_ref[0] = cov_out_ref[0] - yty.astype(cov_out_ref.dtype)

        @pl.when(k == pl.num_programs(1) - 1)
        def _():
            mean_out_ref[0] = (mean_ref[0].astype(jnp.float32)
                               + mean_acc_ref[...]).astype(mean_out_ref.dtype)

    return kernel


def _vmem_capacity_bytes():
    """Physical per-core VMEM (128 MiB v5e/v6e, 64 MiB v7x); safe fallback."""
    try:
        cap = int(pltpu.get_tpu_info().vmem_capacity_bytes)
        if cap > 0:
            return min(max(cap, 32 * _MIB), 128 * _MIB)
    except Exception:
        pass
    return 128 * _MIB


def _pick_tk(N, M, D, itemsize, budget_bytes, max_tk=None):
    """Pick the reduction tile tk and (possibly padded) Npad.

    Streamed-per-step bytes (double-buffered Kt, Yt, alpha tiles) must fit the
    budget.  tk is either the full N (no padding) or a multiple of 128; N is
    zero-padded up to a multiple of tk when tk < N does not divide it.
    """
    def streamed(tk):
        return 2 * itemsize * (2 * M * tk + tk * D)

    if (max_tk is None or N <= max_tk) and streamed(N) <= budget_bytes:
        return N, N

    cap = N if max_tk is None else min(N, max_tk)
    best = 128
    tk = 128
    while tk <= cap:
        if streamed(tk) <= budget_bytes:
            best = tk
        tk += 128
    npad = ((N + best - 1) // best) * best
    return best, npad


def gp_test_full_cov(L, alpha, K_train_test, K_test_test, mean, var=None, *,
                     use_bf16=True, max_tk=None):
    B, N, M = K_train_test.shape
    D = alpha.shape[-1]
    cov_dtype = K_test_test.dtype
    mean_dtype = mean.dtype
    has_var = var is not None

    # Transposed layout (B, M, N): reduction axis N lands on lanes and both
    # in-kernel contractions are MXU-native (no vxpose).
    Kt = jnp.swapaxes(K_train_test, 1, 2)

    # ONE triangular solve instead of cholesky_solve's two:
    #   Yt @ L^T = Kt  =>  Yt = Kt L^{-T},  Yt @ Yt^T = K^T (L L^T)^{-1} K
    # TODO(synk): sequential triangular back-substitution has no clean Pallas/MXU
    # mapping; kept in XLA glue.
    Yt = lax.linalg.triangular_solve(L, Kt, left_side=False, lower=True,
                                     transpose_a=True)

    # f32 covariance base (accumulated directly into the output block).
    Ktt = K_test_test if cov_dtype == jnp.float32 else K_test_test.astype(jnp.float32)

    in_dtype = jnp.bfloat16 if use_bf16 else jnp.float32
    itemsize = 2 if use_bf16 else 4
    Kt_in = Kt.astype(in_dtype)
    Yt_in = Yt.astype(in_dtype)
    alpha_in = alpha.astype(in_dtype)

    if has_var:
        var_row = jnp.asarray(var, jnp.float32).reshape(1, M)

    # ---- Generation-aware VMEM budget ---------------------------------------
    vmem_cap = _vmem_capacity_bytes()
    vmem_limit_cap = vmem_cap - 16 * _MIB          # headroom for Mosaic internals

    # Per-batch resident blocks (mean, K_test_test, var, both outputs) are still
    # double-buffered by the auto-pipeliner (index_map changes with b), so count
    # them x2; plus the small f32 mean accumulator scratch.
    # TODO(synk): marking the per-b-constant-in-k blocks with
    # pipeline_mode=pl.Buffered(1) would drop ~half of this on very large M.
    resident = (2 * 4 * (2 * M * M + 2 * M * D + (M if has_var else 0))
                + 4 * M * D)
    budget = vmem_limit_cap - resident

    tk, Npad = _pick_tk(N, M, D, itemsize, budget, max_tk=max_tk)
    if Npad > N:
        pad = Npad - N
        # Zero padding along N is exact: padded columns contribute 0 to both dots.
        Kt_in = jnp.pad(Kt_in, ((0, 0), (0, 0), (0, pad)))
        Yt_in = jnp.pad(Yt_in, ((0, 0), (0, 0), (0, pad)))
        alpha_in = jnp.pad(alpha_in, ((0, 0), (0, pad), (0, 0)))
    num_k = Npad // tk

    streamed = 2 * itemsize * (2 * M * tk + tk * D)
    vmem_limit = int(min(max(resident + streamed + 4 * _MIB, 32 * _MIB),
                         vmem_limit_cap))
    # TODO(synk): for very large M (M*M blocks past the VMEM budget, esp. v7x)
    # the covariance should additionally be tiled over the test axes ("parallel"
    # M-row tiles); not needed at these sizes.

    in_specs = [
        pl.BlockSpec((1, M, tk), lambda b, k: (b, 0, k)),   # Kt
        pl.BlockSpec((1, M, tk), lambda b, k: (b, 0, k)),   # Yt
        pl.BlockSpec((1, tk, D), lambda b, k: (b, k, 0)),   # alpha
        pl.BlockSpec((1, M, D),  lambda b, k: (b, 0, 0)),   # mean
        pl.BlockSpec((1, M, M),  lambda b, k: (b, 0, 0)),   # K_test_test (f32)
    ]
    args = [Kt_in, Yt_in, alpha_in, mean, Ktt]
    if has_var:
        in_specs.append(pl.BlockSpec((1, M), lambda b, k: (0, 0)))  # var row
        args.append(var_row)

    out_shapes = (jax.ShapeDtypeStruct((B, M, D), mean_dtype),
                  jax.ShapeDtypeStruct((B, M, M), jnp.float32))
    out_specs = [
        pl.BlockSpec((1, M, D), lambda b, k: (b, 0, 0)),    # pred_mean
        pl.BlockSpec((1, M, M), lambda b, k: (b, 0, 0)),    # pred_cov
    ]

    pred_mean, pred_cov = pl.pallas_call(
        _make_gp_kernel(has_var),
        out_shape=out_shapes,
        grid_spec=pltpu.PrefetchScalarGridSpec(
            num_scalar_prefetch=0,
            grid=(B, num_k),
            in_specs=in_specs,
            out_specs=out_specs,
            scratch_shapes=[pltpu.VMEM((M, D), jnp.float32)],  # mean accumulator
        ),
        input_output_aliases={4: 1},   # K_test_test buffer -> pred_cov
        compiler_params=pltpu.CompilerParams(
            dimension_semantics=("parallel", "arbitrary"),
            vmem_limit_bytes=vmem_limit),
    )(*args)

    pred_cov = pred_cov.astype(cov_dtype)
    # matches torch's pred_cov.unsqueeze(-1)
    return pred_mean, pred_cov[..., None]


if __name__ == "__main__":
    key = jax.random.PRNGKey(0)

    def make_inputs(k, B, N, M, D, with_var=True):
        k1, k2, k3, k4, k5, k6 = jax.random.split(k, 6)
        A = jax.random.normal(k1, (B, N, N), jnp.float32)
        K_train_train = (jnp.einsum('bij,bkj->bik', A, A)
                         + N * jnp.eye(N, dtype=jnp.float32)[None])
        L = jnp.linalg.cholesky(K_train_train)                           # (B, N, N)
        alpha = jax.random.normal(k2, (B, N, D), jnp.float32)            # (B, N, D)
        K_train_test = jax.random.normal(k3, (B, N, M), jnp.float32)     # (B, N, M)
        Q = jax.random.normal(k4, (B, M, M), jnp.float32)
        K_test_test = jnp.einsum('bij,bkj->bik', Q, Q)                   # (B, M, M)
        mean = jax.random.normal(k5, (B, M, D), jnp.float32)             # (B, M, D)
        var = (jax.nn.softplus(jax.random.normal(k6, (M,), jnp.float32))
               if with_var else None)
        return L, alpha, K_train_test, K_test_test, mean, var

    def reference(L, alpha, K_train_test, K_test_test, mean, var):
        ref_mean = mean + jnp.einsum('bnm,bnd->bmd', K_train_test, alpha)
        v = jax.vmap(lambda l, b: jax.scipy.linalg.cho_solve((l, True), b))(
            L, K_train_test)
        ref_cov = K_test_test - jnp.einsum('bnm,bnk->bmk', K_train_test, v)
        if var is not None:
            ref_cov = ref_cov + jnp.diag(var)[None]
        return ref_mean, ref_cov[..., None]

    k_small, k_med = jax.random.split(key)

    # 1) Small shapes, f32 operands (strict check); single k-step, grid=(B, 1).
    B, N, M, D = 2, 16, 16, 8
    inputs = make_inputs(k_small, B, N, M, D, with_var=True)
    pred_mean, pred_cov = jax.block_until_ready(
        gp_test_full_cov(*inputs, use_bf16=False))
    ref_mean, ref_cov = reference(*inputs)
    assert pred_mean.shape == (B, M, D) and pred_cov.shape == (B, M, M, 1)
    np.testing.assert_allclose(np.asarray(pred_mean), np.asarray(ref_mean),
                               rtol=2e-3, atol=2e-3)
    np.testing.assert_allclose(np.asarray(pred_cov), np.asarray(ref_cov),
                               rtol=2e-3, atol=2e-3)

    # 2) Larger shapes, default bf16 operands, forced N-reduction tiling
    #    (max_tk=128 -> grid=(B, 2)); looser, magnitude-scaled tolerances.
    B2, N2, M2, D2 = 2, 256, 128, 8
    inputs2 = make_inputs(k_med, B2, N2, M2, D2, with_var=False)
    pred_mean2, pred_cov2 = jax.block_until_ready(
        gp_test_full_cov(*inputs2, max_tk=128))
    ref_mean2, ref_cov2 = reference(*inputs2)
    assert pred_mean2.shape == (B2, M2, D2) and pred_cov2.shape == (B2, M2, M2, 1)
    rm = np.asarray(ref_mean2)
    rc = np.asarray(ref_cov2)
    np.testing.assert_allclose(np.asarray(pred_mean2), rm,
                               rtol=2e-2, atol=2e-2 * np.abs(rm).max())
    np.testing.assert_allclose(np.asarray(pred_cov2), rc,
                               rtol=2e-2, atol=2e-2 * np.abs(rc).max())

    print("KERNEL_OK")
</pallas_src>

<mosaic_0001>
module attributes {stable_mosaic.version = 11 : i64} {
  func.func @kernel(%arg0: i32, %arg1: i32, %arg2: memref<1x16x16xf32, #tpu.memory_space<vmem>>, %arg3: memref<1x16x16xf32, #tpu.memory_space<vmem>>, %arg4: memref<1x16x8xf32, #tpu.memory_space<vmem>>, %arg5: memref<1x16x8xf32, #tpu.memory_space<vmem>>, %arg6: memref<1x16x16xf32, #tpu.memory_space<vmem>>, %arg7: memref<1x16xf32, #tpu.memory_space<vmem>>, %arg8: memref<1x16x8xf32, #tpu.memory_space<vmem>>, %arg9: memref<1x16x16xf32, #tpu.memory_space<vmem>>, %arg10: memref<16x8xf32, #tpu.memory_space<vmem>>) attributes {dimension_semantics = [#tpu.dimension_semantics<parallel>, #tpu.dimension_semantics<arbitrary>], iteration_bounds = array<i64: 2, 1>, scalar_prefetch = 0 : i64, scratch_operands = 1 : i64, tpu.core_type = #tpu.core_type<tc>, window_params = [{transform_indices = @transform_0, window_bounds = array<i64: 1, 16, 16>}, {transform_indices = @transform_1, window_bounds = array<i64: 1, 16, 16>}, {transform_indices = @transform_2, window_bounds = array<i64: 1, 16, 8>}, {transform_indices = @transform_3, window_bounds = array<i64: 1, 16, 8>}, {transform_indices = @transform_4, window_bounds = array<i64: 1, 16, 16>}, {pipeline_mode = #tpu.pipeline_mode<synchronous>, transform_indices = @transform_5, window_bounds = array<i64: 1, 16>}, {transform_indices = @transform_6, window_bounds = array<i64: 1, 16, 8>}, {transform_indices = @transform_7, window_bounds = array<i64: 1, 16, 16>}]} {
    %c0_i32 = arith.constant 0 : i32
    %0 = arith.cmpi eq, %arg1, %c0_i32 : i32
    %1 = arith.extui %0 : i1 to i32
    %c0_i32_0 = arith.constant 0 : i32
    %2 = arith.cmpi ne, %1, %c0_i32_0 : i32
    scf.if %2 {
      %cst_22 = arith.constant 0.000000e+00 : f32
      %23 = vector.broadcast %cst_22 : f32 to vector<16x8xf32>
      %c0_23 = arith.constant 0 : index
      %c0_24 = arith.constant 0 : index
      %24 = vector.load %arg10[%c0_23, %c0_24] : memref<16x8xf32, #tpu.memory_space<vmem>>, vector<16x8xf32>
      tpu.vector_store %arg10[%c0_23, %c0_24], %23 {strides = array<i32>} : memref<16x8xf32, #tpu.memory_space<vmem>>, vector<16x8xf32>,
      %c0_25 = arith.constant 0 : index
      %c0_26 = arith.constant 0 : index
      %c0_27 = arith.constant 0 : index
      %25 = vector.load %arg6[%c0_25, %c0_26, %c0_27] : memref<1x16x16xf32, #tpu.memory_space<vmem>>, vector<1x16x16xf32>
      %26 = vector.shape_cast %25 : vector<1x16x16xf32> to vector<16x16xf32>
      %27 = tpu.iota {dimensions = array<i32: 0>} : vector<16x16xi32>
      %28 = tpu.iota {dimensions = array<i32: 1>} : vector<16x16xi32>
      %29 = arith.cmpi eq, %27, %28 : vector<16x16xi32>
      %c0_28 = arith.constant 0 : index
      %c0_29 = arith.constant 0 : index
      %30 = vector.load %arg7[%c0_28, %c0_29] : memref<1x16xf32, #tpu.memory_space<vmem>>, vector<1x16xf32>
      %cst_30 = arith.constant 0.000000e+00 : f32
      %31 = vector.shape_cast %30 : vector<1x16xf32> to vector<1x16xf32>
      %32 = vector.broadcast %31 : vector<1x16xf32> to vector<16x16xf32>
      %33 = vector.broadcast %cst_30 : f32 to vector<16x16xf32>
      %34 = arith.select %29, %32, %33 : vector<16x16xi1>, vector<16x16xf32>
      %35 = arith.addf %26, %34 : vector<16x16xf32>
      %c0_31 = arith.constant 0 : index
      %c0_32 = arith.constant 0 : index
      %c0_33 = arith.constant 0 : index
      %36 = vector.load %arg9[%c0_31, %c0_32, %c0_33] : memref<1x16x16xf32, #tpu.memory_space<vmem>>, vector<1x16x16xf32>
      %37 = vector.shape_cast %36 : vector<1x16x16xf32> to vector<16x16xf32>
      %38 = vector.shape_cast %35 : vector<16x16xf32> to vector<1x16x16xf32>
      tpu.vector_store %arg9[%c0_31, %c0_32, %c0_33], %38 {strides = array<i32>} : memref<1x16x16xf32, #tpu.memory_space<vmem>>, vector<1x16x16xf32>,
    } else {
    }
    %c0 = arith.constant 0 : index
    %c0_1 = arith.constant 0 : index
    %c0_2 = arith.constant 0 : index
    %3 = vector.load %arg2[%c0, %c0_1, %c0_2] : memref<1x16x16xf32, #tpu.memory_space<vmem>>, vector<1x16x16xf32>
    %4 = vector.shape_cast %3 : vector<1x16x16xf32> to vector<16x16xf32>
    %c0_3 = arith.constant 0 : index
    %c0_4 = arith.constant 0 : index
    %c0_5 = arith.constant 0 : index
    %5 = vector.load %arg3[%c0_3, %c0_4, %c0_5] : memref<1x16x16xf32, #tpu.memory_space<vmem>>, vector<1x16x16xf32>
    %6 = vector.shape_cast %5 : vector<1x16x16xf32> to vector<16x16xf32>
    %c0_6 = arith.constant 0 : index
    %c0_7 = arith.constant 0 : index
    %c0_8 = arith.constant 0 : index
    %7 = vector.load %arg4[%c0_6, %c0_7, %c0_8] : memref<1x16x8xf32, #tpu.memory_space<vmem>>, vector<1x16x8xf32>
    %8 = vector.shape_cast %7 : vector<1x16x8xf32> to vector<16x8xf32>
    %c0_9 = arith.constant 0 : index
    %c0_10 = arith.constant 0 : index
    %9 = vector.load %arg10[%c0_9, %c0_10] : memref<16x8xf32, #tpu.memory_space<vmem>>, vector<16x8xf32>
    %cst = arith.constant dense<0.000000e+00> : vector<16x8xf32>
    %10 = tpu.matmul %4, %8, %cst {dimension_numbers = #tpu.dot_dimension_numbers<[1], [0], [0], [1], [0, 0, 1, 1], [], []>} : vector<16x16xf32>, vector<16x8xf32>, vector<16x8xf32> -> vector<16x8xf32>
    %11 = arith.addf %9, %10 : vector<16x8xf32>
    %c0_11 = arith.constant 0 : index
    %c0_12 = arith.constant 0 : index
    %12 = vector.load %arg10[%c0_11, %c0_12] : memref<16x8xf32, #tpu.memory_space<vmem>>, vector<16x8xf32>
    tpu.vector_store %arg10[%c0_11, %c0_12], %11 {strides = array<i32>} : memref<16x8xf32, #tpu.memory_space<vmem>>, vector<16x8xf32>,
    %cst_13 = arith.constant dense<0.000000e+00> : vector<16x16xf32>
    %13 = tpu.matmul %6, %6, %cst_13 {dimension_numbers = #tpu.dot_dimension_numbers<[1], [1], [0], [0], [0, 0, 1, 0], [], []>} : vector<16x16xf32>, vector<16x16xf32>, vector<16x16xf32> -> vector<16x16xf32>
    %c0_14 = arith.constant 0 : index
    %c0_15 = arith.constant 0 : index
    %c0_16 = arith.constant 0 : index
    %14 = vector.load %arg9[%c0_14, %c0_15, %c0_16] : memref<1x16x16xf32, #tpu.memory_space<vmem>>, vector<1x16x16xf32>
    %15 = vector.shape_cast %14 : vector<1x16x16xf32> to vector<16x16xf32>
    %16 = arith.subf %15, %13 : vector<16x16xf32>
    %c0_17 = arith.constant 0 : index
    %c0_18 = arith.constant 0 : index
    %c0_19 = arith.constant 0 : index
    %17 = vector.load %arg9[%c0_17, %c0_18, %c0_19] : memref<1x16x16xf32, #tpu.memory_space<vmem>>, vector<1x16x16xf32>
    %18 = vector.shape_cast %17 : vector<1x16x16xf32> to vector<16x16xf32>
    %19 = vector.shape_cast %16 : vector<16x16xf32> to vector<1x16x16xf32>
    tpu.vector_store %arg9[%c0_17, %c0_18, %c0_19], %19 {strides = array<i32>} : memref<1x16x16xf32, #tpu.memory_space<vmem>>, vector<1x16x16xf32>,
    %c0_i32_20 = arith.constant 0 : i32
    %20 = arith.cmpi eq, %arg1, %c0_i32_20 : i32
    %21 = arith.extui %20 : i1 to i32
    %c0_i32_21 = arith.constant 0 : i32
    %22 = arith.cmpi ne, %21, %c0_i32_21 : i32
    scf.if %22 {
      %c0_22 = arith.constant 0 : index
      %c0_23 = arith.constant 0 : index
      %c0_24 = arith.constant 0 : index
      %23 = vector.load %arg5[%c0_22, %c0_23, %c0_24] : memref<1x16x8xf32, #tpu.memory_space<vmem>>, vector<1x16x8xf32>
      %24 = vector.shape_cast %23 : vector<1x16x8xf32> to vector<16x8xf32>
      %c0_25 = arith.constant 0 : index
      %c0_26 = arith.constant 0 : index
      %25 = vector.load %arg10[%c0_25, %c0_26] : memref<16x8xf32, #tpu.memory_space<vmem>>, vector<16x8xf32>
      %26 = arith.addf %24, %25 : vector<16x8xf32>
      %c0_27 = arith.constant 0 : index
      %c0_28 = arith.constant 0 : index
      %c0_29 = arith.constant 0 : index
      %27 = vector.load %arg8[%c0_27, %c0_28, %c0_29] : memref<1x16x8xf32, #tpu.memory_space<vmem>>, vector<1x16x8xf32>
      %28 = vector.shape_cast %27 : vector<1x16x8xf32> to vector<16x8xf32>
      %29 = vector.shape_cast %26 : vector<16x8xf32> to vector<1x16x8xf32>
      tpu.vector_store %arg8[%c0_27, %c0_28, %c0_29], %29 {strides = array<i32>} : memref<1x16x8xf32, #tpu.memory_space<vmem>>, vector<1x16x8xf32>,
    } else {
    }
    return
  }
  func.func @transform_0(%arg0: i32, %arg1: i32) -> (i32, i32, i32) {
    %c0_i32 = arith.constant 0 : i32
    %c0_i32_0 = arith.constant 0 : i32
    return %arg0, %c0_i32, %arg1 : i32, i32, i32
  }
  func.func @transform_1(%arg0: i32, %arg1: i32) -> (i32, i32, i32) {
    %c0_i32 = arith.constant 0 : i32
    %c0_i32_0 = arith.constant 0 : i32
    return %arg0, %c0_i32, %arg1 : i32, i32, i32
  }
  func.func @transform_2(%arg0: i32, %arg1: i32) -> (i32, i32, i32) {
    %c0_i32 = arith.constant 0 : i32
    %c0_i32_0 = arith.constant 0 : i32
    return %arg0, %arg1, %c0_i32 : i32, i32, i32
  }
  func.func @transform_3(%arg0: i32, %arg1: i32) -> (i32, i32, i32) {
    %c0_i32 = arith.constant 0 : i32
    %c0_i32_0 = arith.constant 0 : i32
    %c0_i32_1 = arith.constant 0 : i32
    return %arg0, %c0_i32, %c0_i32_0 : i32, i32, i32
  }
  func.func @transform_4(%arg0: i32, %arg1: i32) -> (i32, i32, i32) {
    %c0_i32 = arith.constant 0 : i32
    %c0_i32_0 = arith.constant 0 : i32
    %c0_i32_1 = arith.constant 0 : i32
    return %arg0, %c0_i32, %c0_i32_0 : i32, i32, i32
  }
  func.func @transform_5(%arg0: i32, %arg1: i32) -> (i32, i32) {
    %c0_i32 = arith.constant 0 : i32
    %c0_i32_0 = arith.constant 0 : i32
    %c0_i32_1 = arith.constant 0 : i32
    return %c0_i32, %c0_i32_0 : i32, i32
  }
  func.func @transform_6(%arg0: i32, %arg1: i32) -> (i32, i32, i32) {
    %c0_i32 = arith.constant 0 : i32
    %c0_i32_0 = arith.constant 0 : i32
    %c0_i32_1 = arith.constant 0 : i32
    return %arg0, %c0_i32, %c0_i32_0 : i32, i32, i32
  }
  func.func @transform_7(%arg0: i32, %arg1: i32) -> (i32, i32, i32) {
    %c0_i32 = arith.constant 0 : i32
    %c0_i32_0 = arith.constant 0 : i32
    %c0_i32_1 = arith.constant 0 : i32
    return %arg0, %c0_i32, %c0_i32_0 : i32, i32, i32
  }
}

</mosaic_0001>

<bundles_post_ra>
// kernel: tpu_custom_call.1
= control target key start
LH: loop header
LB: loop body
LE: loop exit
PB: predicated region body
PF: predicated region fallthrough
CT: control target
= control target key end

     0   :  { %s964_s24 = smov 0   ;;  %s966_s25 = smov 0   ;;  %s1040_s0 = inlined_call_operand.vmem [shape: f32[2,16,16], index: 0, kind: input, shape index: {}]   ;;  %s1041_s1 = inlined_call_operand.vmem [shape: f32[2,16,16], index: 1, kind: input, shape index: {}]   ;;  %s1042_s2 = inlined_call_operand.vmem [shape: f32[2,16,8], index: 2, kind: input, shape index: {}]   ;;  %s1043_s3 = inlined_call_operand.vmem [shape: f32[2,16,8], index: 3, kind: input, shape index: {}]   ;;  %s1044_s4 = inlined_call_operand.vmem [shape: f32[2,16,16], index: 4, kind: input, shape index: {}, may-alias: {4,7}]   ;;  %s1045_s5 = inlined_call_operand.vmem [shape: f32[1,16], index: 5, kind: input, shape index: {}]   ;;  %s1046_s6 = inlined_call_operand.vmem [shape: f32[2,16,8], index: 6, kind: output, shape index: {0}]   ;;  %s1047_s7 = inlined_call_operand.vmem [shape: f32[2,16,16], index: 7, kind: output, shape index: {1}, may-alias: {4,7}]  }
   0x1   :  { %s968_s26 = smov 0  }
   0x2 LB: > { %s30_s27 = sadd.s32 1, %s917_s25  ;;  %p811_p0 = scmp.ge.s32.totalorder %s921_s26, 1  ;;  %s921_s26 = sphi %s968_s26, %s18_s26   ;;  %s917_s25 = sphi %s966_s25, %s1049_s25   ;;  %s913_s24 = sphi %s964_s24, %s1048_s24  }
   0x3   : > { %p32_p1 = scmp.ge.s32.totalorder %s30_s27, 2  ;;  %p309_p2 = scmp.lt.s32.totalorder %s921_s26, 3 }
   0x5   : > { %s1051_s27 = smov (%p32_p1, %s30_s27), 0  ;;  %p310_p3 = pnand %p811_p0, %p309_p2 }
   0x6   : > { %p376_p4 = scmp.lt.s32.totalorder (!%p310_p3), %s913_s24, 1  ;;  %vm426_vm0 = vcmask (!%p310_p3), 64512   ;;  %v923_v0 = vmov (!%p310_p3), 0.0   ;;  %vm449_vm1 = vcmask (!%p310_p3), 130048   ;;  %v431_v9 = vlaneseq (!%p310_p3)  ;;  %v826_v13 = vld [vmem:[%s1045_s5] ss:$0 sm:$0xff] (!%p310_p3) }
   0x7   : > { %313 = sbr.rel (%p310_p3) target bundleno = 250 (0xfa), region = 44  ;;  %428 = vst.msk [vmem:[#allocation2 + $0x8] sm:$0xff] (!%p310_p3), %vm426_vm0, %v923_v0  ;;  %427 = vst.msk [vmem:[#allocation2] sm:$0xff] (!%p310_p3), %vm426_vm0, %v923_v0 }
   0x8   : > { %vm869_vm2 = vmpackc.low (!%p310_p3), %vm449_vm1, %vm449_vm1  ;;  %v432_v10 = vshrl.u32 (!%p310_p3), %v431_v9, 7  ;;  %v435_v12 = vand.u32 (!%p310_p3), 127, %v431_v9 }
   0xa   : > { %v433_v11 = vadd.s32 (!%p310_p3), 8, %v432_v10  ;;  %vm436_vm3 = vcmp.eq.s32.totalorder (!%p310_p3), %v432_v10, %v435_v12 }
   0xb   : > { %v445_v16 = vsel (!%p310_p3), %vm436_vm3, %v826_v13, 0.0 }
   0xc   : > { %vm437_vm4 = vcmp.eq.s32.totalorder (!%p310_p3), %v433_v11, %v435_v12 }
   0xd   : > { %v446_v17 = vsel (!%p310_p3), %vm437_vm4, %v826_v13, 0.0 }
   0xe   : > { %s1053_s24 = smov (!%p376_p4, %s913_s24), 1  ;;  %v459_v20 = vld [vmem:[#allocation2 + $0x8] sm:$0xff]  ;;  %v458_v21 = vld [vmem:[#allocation2] sm:$0xff] }
   0xf   : > { %s984_s28 = sshll.u32 %s1053_s24, 4 }
  0x10   : > { %s400_s8 = scalar_lea.vmem %s1042_s2, %s984_s28  ;;  %s383_s11 = scalar_lea.vmem %s1040_s0, %s984_s28 }
  0x11   : > { %v456_v1 = vld [vmem:[%s400_s8] sm:$0xff]  ;;  %v457_v2 = vld [vmem:[%s400_s8 + $0x8] sm:$0xff]  ;;  %s391_s14 = scalar_lea.vmem %s1041_s1, %s984_s28  ;;  %s411_s17 = scalar_lea.vmem %s1044_s4, %s984_s28 }
  0x12   : > { %v864_v3 = vpack.c.bf16 %v457_v2, %v456_v1  ;;  %v452_v4 = vld [vmem:[%s383_s11] sm:$0xff]  ;;  %v455_v6 = vld [vmem:[%s391_s14 + $0x8] sm:$0xff]  ;;  %s421_s22 = scalar_lea.vmem %s1047_s7, %s984_s28  ;;  %s406_s29 = scalar_lea.vmem %s1043_s3, %s984_s28 }
  0x13   : > { %v454_v5 = vld [vmem:[%s391_s14] sm:$0xff]  ;;  %854 = vmatprep.mubr.msk.f32.mxu0 %vm449_vm1, %v452_v4  ;;  %v453_v8 = vld [vmem:[%s383_s11 + $0x8] sm:$0xff]  ;;  %s416_s9 = scalar_lea.vmem %s1046_s6, %s984_s28 }
  0x14   : > { %861 = vmatprep.mubr.msk.f32.mxu1 %vm449_vm1, %v454_v5  ;;  %865 = vmatprep.subr.bf16.mxu0 %v864_v3  ;;  %v868_v7 = vpack.c.bf16 %v455_v6, %v454_v5  ;;  %v429_v14 = vld [vmem:[%s411_s17] sm:$0xff]  ;;  %v430_v15 = vld [vmem:[%s411_s17 + $0x8] sm:$0xff] }
  0x15   : > { %867 = vmatpush3.bf16.msra.mxu0 %v864_v3  ;;  %v447_v18 = vadd.f32 %v445_v16, %v429_v14  ;;  %v448_v19 = vadd.f32 %v446_v17, %v430_v15  ;;  %v638_v31 = vld [vmem:[%s406_s29 + $0x8] sm:$0xff]  ;;  %v637_v33 = vld [vmem:[%s406_s29] sm:$0xff] }
  0x16   : > { %870 = vmatprep.subr.msk.bf16.mxu1 %vm869_vm2, %v868_v7 }
  0x17   : > { %873 = vmatpush3.bf16.xpose.msk.msra.mxu1 %vm869_vm2, %v868_v7  ;;  %450 = vst.msk [vmem:[%s421_s22] sm:$0xff] %vm449_vm1, %v447_v18  ;;  %451 = vst.msk [vmem:[%s421_s22 + $0x8] sm:$0xff] %vm449_vm1, %v448_v19 }
  0x18   : > { %855 = vmatmul.mubr.msk.f32.vlgmr.msra.gmra.mrb[0].mxu0 %vm449_vm1, %v453_v8 }
  0x1e   : > { %862 = vmatmul.mubr.msk.f32.vlgmr.msra.gmra.mrb[0].mxu1 %vm449_vm1, %v455_v6  ;;  %v629_v26 = vld [vmem:[%s421_s22 + $0x8] sm:$0xff]  ;;  %v628_v27 = vld [vmem:[%s421_s22] sm:$0xff] }
  0xeb   : > { %v856_v22 = vpop.f32.mrb[0].mxu0 }
  0xec   : > { %v543_v23 = vadd.f32 %v856_v22, %v459_v20  ;;  %v533_v24 = vpop.f32.mrb[1].mxu0 }
  0xed   : > { %v542_v25 = vadd.f32 %v533_v24, %v458_v21 }
  0xee   : > { %546 = vst.msk [vmem:[#allocation2 + $0x8] sm:$0xff] %vm426_vm0, %v543_v23 }
  0xef   : > { %545 = vst.msk [vmem:[#allocation2] sm:$0xff] %vm426_vm0, %v542_v25 }
  0xf1   : > { %v863_v28 = vpop.f32.mrb[0].mxu1 }
  0xf2   : > { %v631_v29 = vsub.f32 %v629_v26, %v863_v28  ;;  %v619_v30 = vpop.f32.mrb[1].mxu1 }
  0xf3   : > { %v630_v32 = vsub.f32 %v628_v27, %v619_v30 }
  0xf4   : > { %633 = vst.msk [vmem:[%s421_s22 + $0x8] sm:$0xff] %vm449_vm1, %v631_v29 }
  0xf5   : > { %v640_v34 = vld [vmem:[#allocation2 + $0x8] sm:$0xff]  ;;  %632 = vst.msk [vmem:[%s421_s22] sm:$0xff] %vm449_vm1, %v630_v32 }
  0xf6   : > { %v642_v35 = vadd.f32 %v640_v34, %v638_v31  ;;  %v639_v36 = vld [vmem:[#allocation2] sm:$0xff] }
  0xf7   : > { %v641_v37 = vadd.f32 %v639_v36, %v637_v33 }
  0xf8   : > { %644 = vst.msk [vmem:[%s416_s9 + $0x8] sm:$0xff] %vm426_vm0, %v642_v35 }
  0xf9   : > { %643 = vst.msk [vmem:[%s416_s9] sm:$0xff] %vm426_vm0, %v641_v37 }
  0xfa PF: > { %s18_s26 = sadd.s32 1, %s921_s26   ;;  %s1048_s24 = smov %s917_s25 }
  0xfb   : > { %p15_p5 = scmp.ge.s32.totalorder %s18_s26, 4   ;;  %s1049_s25 = smov %s1051_s27 }
  0xfd   :  { %17 = sbr.rel (!%p15_p5) target bundleno = 2 (0x2), region = 106 }

</bundles_post_ra>
